<compile_context>
chip_gen: v7x
topology: tpu7x:2x2x1
jax: 0.10.0
libtpu: 0.0.40
codegen_flags: <defaults>
</compile_context>

<pallas_src>
import jax
import jax.numpy as jnp
from jax import lax
from jax.experimental import pallas as pl
from jax.experimental.pallas import tpu as pltpu


def _contrastive_kernel(temperature):
    """Returns the kernel closure over the (static) temperature."""
    inv_temp = 1.0 / float(temperature)

    def kernel(x_ref, w1_ref, b1_ref, w2_ref, b2_ref,
               lab_col_ref, lab_row_ref, out_ref, acc_ref):
        k = pl.program_id(0)

        # ---- first Linear, accumulated over DIN tiles (bf16 MXU operands, f32 acc) ----
        @pl.when(k == 0)
        def _():
            acc_ref[...] = jnp.zeros_like(acc_ref)

        acc_ref[...] += jnp.dot(x_ref[...].astype(jnp.bfloat16),
                                w1_ref[...].astype(jnp.bfloat16),
                                preferred_element_type=jnp.float32)

        # ---- epilogue on the last K tile: ReLU -> Linear -> normalize -> loss ----
        @pl.when(k == pl.num_programs(0) - 1)
        def _():
            h = jnp.maximum(acc_ref[...] + b1_ref[...], 0.0)               # (B, MID) f32
            y = jnp.dot(h.astype(jnp.bfloat16),
                        w2_ref[...].astype(jnp.bfloat16),
                        preferred_element_type=jnp.float32) + b2_ref[...]  # (B, OUT) f32

            # F.normalize(y): y * rsqrt(max(||y||^2, 1e-24)) == y / max(||y||, 1e-12)
            sumsq = jnp.sum(y * y, axis=1, keepdims=True)
            yn = y * lax.rsqrt(jnp.maximum(sumsq, 1e-24))

            B = yn.shape[0]
            rows = lax.broadcasted_iota(jnp.int32, (B, B), 0)
            cols = lax.broadcasted_iota(jnp.int32, (B, B), 1)
            not_diag = rows != cols
            same_lab = lab_col_ref[...] == lab_row_ref[...]                # (B, B) bool
            pos = jnp.where(jnp.logical_and(same_lab, not_diag), 1.0, 0.0)  # positives, no diag
            denom_mask = not_diag.astype(jnp.float32)
            # torch: mask.sum(1) includes the diagonal self-pair -> +1.
            den = jnp.sum(pos, axis=1, keepdims=True) + 1.0                # (B, 1)

            # logits = (yn @ yn.T) / temperature; f32 MXU keeps softmax precision at small B.
            logits = lax.dot_general(
                yn, yn, (((1,), (1,)), ((), ())),
                preferred_element_type=jnp.float32) * inv_temp             # (B, B)
            logits = logits - jnp.max(logits, axis=1, keepdims=True)
            log_denom = jnp.log(
                jnp.sum(jnp.exp(logits) * denom_mask, axis=1, keepdims=True))
            prob = logits - log_denom

            num = jnp.sum(pos * prob, axis=1, keepdims=True)               # (B, 1)
            loss = -jnp.sum(num / den) * (1.0 / B)
            out_ref[0, 0] = loss                                           # SMEM scalar store

    return kernel


def contrastive_loss(x_nchw, label, w1, b1, w2, b2, temperature=0.1):
    """x_nchw: (B,C,H,W); label: (B,); w1: (Din,Mid); w2: (Mid,Dout) -- weights are the
    transposes of torch nn.Linear.weight, so the kernel computes x @ W + b (== x @ W.T + b)."""
    B = x_nchw.shape[0]
    DIN, MID = w1.shape
    OUT = w2.shape[1]

    # Row-major flatten == torch x.view(B, -1).  No dtype casts here: a wrapper-side
    # astype is a separate, un-fusable XLA op and only adds HBM traffic.  The kernel
    # casts to bf16 on-chip (or pass bf16-persisted weights, which it also accepts).
    x_flat = x_nchw.reshape(B, -1)
    b1_2d = b1.reshape(1, MID).astype(jnp.float32)
    b2_2d = b2.reshape(1, OUT).astype(jnp.float32)
    lab_col = label.reshape(B, 1).astype(jnp.int32)
    lab_row = label.reshape(1, B).astype(jnp.int32)

    # K-grid over DIN: ~512-wide tiles pipeline the x/w1 DMA with the MXU and keep the
    # resident (double-buffered) weight tiles small for v7x's 32 MiB scoped-VMEM default.
    tk = next((t for t in (512, 256, 128) if DIN % t == 0), DIN)
    num_k = DIN // tk

    flops = 2 * B * DIN * MID + 2 * B * MID * OUT + 2 * B * B * OUT
    transcendentals = B * B + 2 * B                       # exp(B,B) + rsqrt(B) + log(B)
    bytes_accessed = int(
        x_flat.size * x_flat.dtype.itemsize
        + w1.size * w1.dtype.itemsize + w2.size * w2.dtype.itemsize
        + b1_2d.size * 4 + b2_2d.size * 4 + 2 * B * 4 + 4)

    out = pl.pallas_call(
        _contrastive_kernel(temperature),
        out_shape=jax.ShapeDtypeStruct((1, 1), jnp.float32),
        grid=(num_k,),
        in_specs=[
            pl.BlockSpec((B, tk), lambda k: (0, k)),      # x   (DIN-tiled)
            pl.BlockSpec((tk, MID), lambda k: (k, 0)),    # w1  (DIN-tiled)
            pl.BlockSpec((1, MID), lambda k: (0, 0)),     # b1  (resident, DMA'd once)
            pl.BlockSpec((MID, OUT), lambda k: (0, 0)),   # w2  (resident, DMA'd once)
            pl.BlockSpec((1, OUT), lambda k: (0, 0)),     # b2  (resident)
            pl.BlockSpec((B, 1), lambda k: (0, 0)),       # labels as column
            pl.BlockSpec((1, B), lambda k: (0, 0)),       # labels as row
        ],
        out_specs=pl.BlockSpec(memory_space=pltpu.MemorySpace.SMEM),
        scratch_shapes=[pltpu.VMEM((B, MID), jnp.float32)],
        compiler_params=pltpu.CompilerParams(
            dimension_semantics=("arbitrary",)),          # K is a reduction axis
        cost_estimate=pl.CostEstimate(flops=flops,
                                      transcendentals=transcendentals,
                                      bytes_accessed=bytes_accessed),
    )(x_flat, w1, b1_2d, w2, b2_2d, lab_col, lab_row)
    return out[0, 0]


if __name__ == "__main__":
    # Small shapes consistent with the module:
    #   ContrastiveLoss(temperature=0.1, mid_neurons=128, out_neurons=256,
    #                   c_in=4, shape=16)  ->  input_neurons = 4*16*16 = 1024
    B, C, H, W = 8, 4, 16, 16
    DIN = C * H * W            # 1024
    MID = 128
    OUT = 256
    TEMPERATURE = 0.1

    key = jax.random.PRNGKey(0)
    kx, kl, kw1, kb1, kw2, kb2 = jax.random.split(key, 6)

    x = jax.random.normal(kx, (B, C, H, W), dtype=jnp.float32)
    label = jax.random.randint(kl, (B,), 0, 4, dtype=jnp.int32)

    # Deterministic Linear init (uniform +/- 1/sqrt(fan_in), like nn.Linear).
    lim1 = 1.0 / (DIN ** 0.5)
    lim2 = 1.0 / (MID ** 0.5)
    w1 = jax.random.uniform(kw1, (DIN, MID), jnp.float32, -lim1, lim1)
    b1 = jax.random.uniform(kb1, (MID,), jnp.float32, -lim1, lim1)
    w2 = jax.random.uniform(kw2, (MID, OUT), jnp.float32, -lim2, lim2)
    b2 = jax.random.uniform(kb2, (OUT,), jnp.float32, -lim2, lim2)

    # NOTE: bf16 MXU operands give ~1e-2-level relative deviation vs a pure-f32 torch
    # reference; set comparison tolerances accordingly.
    loss = contrastive_loss(x, label, w1, b1, w2, b2, temperature=TEMPERATURE)
    jax.block_until_ready(loss)

    print("KERNEL_OK")
</pallas_src>

<mosaic_0001>
module attributes {stable_mosaic.version = 11 : i64} {
  func.func @kernel(%arg0: i32, %arg1: memref<8x512xf32, #tpu.memory_space<vmem>>, %arg2: memref<512x128xf32, #tpu.memory_space<vmem>>, %arg3: memref<1x128xf32, #tpu.memory_space<vmem>>, %arg4: memref<128x256xf32, #tpu.memory_space<vmem>>, %arg5: memref<1x256xf32, #tpu.memory_space<vmem>>, %arg6: memref<8x1xi32, #tpu.memory_space<vmem>>, %arg7: memref<1x8xi32, #tpu.memory_space<vmem>>, %arg8: memref<1x1xf32, #tpu.memory_space<smem>>, %arg9: memref<8x128xf32, #tpu.memory_space<vmem>>) attributes {dimension_semantics = [#tpu.dimension_semantics<arbitrary>], iteration_bounds = array<i64: 2>, scalar_prefetch = 0 : i64, scratch_operands = 1 : i64, tpu.core_type = #tpu.core_type<tc>, window_params = [{transform_indices = @transform_0, window_bounds = array<i64: 8, 512>}, {transform_indices = @transform_1, window_bounds = array<i64: 512, 128>}, {pipeline_mode = #tpu.pipeline_mode<synchronous>, transform_indices = @transform_2, window_bounds = array<i64: 1, 128>}, {pipeline_mode = #tpu.pipeline_mode<synchronous>, transform_indices = @transform_3, window_bounds = array<i64: 128, 256>}, {pipeline_mode = #tpu.pipeline_mode<synchronous>, transform_indices = @transform_4, window_bounds = array<i64: 1, 256>}, {pipeline_mode = #tpu.pipeline_mode<synchronous>, transform_indices = @transform_5, window_bounds = array<i64: 8, 1>}, {pipeline_mode = #tpu.pipeline_mode<synchronous>, transform_indices = @transform_6, window_bounds = array<i64: 1, 8>}, {transform_indices = @transform_7, window_bounds = array<i64: 1, 1>}]} {
    %c0_i32 = arith.constant 0 : i32
    %0 = arith.cmpi eq, %arg0, %c0_i32 : i32
    %1 = arith.extui %0 : i1 to i32
    %c0_i32_0 = arith.constant 0 : i32
    %2 = arith.cmpi ne, %1, %c0_i32_0 : i32
    scf.if %2 {
      %cst_9 = arith.constant 0.000000e+00 : f32
      %14 = vector.broadcast %cst_9 : f32 to vector<8x128xf32>
      %c0_10 = arith.constant 0 : index
      %c0_11 = arith.constant 0 : index
      %15 = vector.load %arg9[%c0_10, %c0_11] : memref<8x128xf32, #tpu.memory_space<vmem>>, vector<8x128xf32>
      tpu.vector_store %arg9[%c0_10, %c0_11], %14 {strides = array<i32>} : memref<8x128xf32, #tpu.memory_space<vmem>>, vector<8x128xf32>,
    } else {
    }
    %c0 = arith.constant 0 : index
    %c0_1 = arith.constant 0 : index
    %3 = vector.load %arg9[%c0, %c0_1] : memref<8x128xf32, #tpu.memory_space<vmem>>, vector<8x128xf32>
    %c0_2 = arith.constant 0 : index
    %c0_3 = arith.constant 0 : index
    %4 = vector.load %arg1[%c0_2, %c0_3] : memref<8x512xf32, #tpu.memory_space<vmem>>, vector<8x512xf32>
    %5 = arith.truncf %4 : vector<8x512xf32> to vector<8x512xbf16>
    %c0_4 = arith.constant 0 : index
    %c0_5 = arith.constant 0 : index
    %6 = vector.load %arg2[%c0_4, %c0_5] : memref<512x128xf32, #tpu.memory_space<vmem>>, vector<512x128xf32>
    %7 = arith.truncf %6 : vector<512x128xf32> to vector<512x128xbf16>
    %cst = arith.constant dense<0.000000e+00> : vector<8x128xf32>
    %8 = tpu.matmul %5, %7, %cst {dimension_numbers = #tpu.dot_dimension_numbers<[1], [0], [0], [1], [0, 0, 1, 1], [], []>} : vector<8x512xbf16>, vector<512x128xbf16>, vector<8x128xf32> -> vector<8x128xf32>
    %9 = arith.addf %3, %8 : vector<8x128xf32>
    %c0_6 = arith.constant 0 : index
    %c0_7 = arith.constant 0 : index
    %10 = vector.load %arg9[%c0_6, %c0_7] : memref<8x128xf32, #tpu.memory_space<vmem>>, vector<8x128xf32>
    tpu.vector_store %arg9[%c0_6, %c0_7], %9 {strides = array<i32>} : memref<8x128xf32, #tpu.memory_space<vmem>>, vector<8x128xf32>,
    %c1_i32 = arith.constant 1 : i32
    %11 = arith.cmpi eq, %arg0, %c1_i32 : i32
    %12 = arith.extui %11 : i1 to i32
    %c0_i32_8 = arith.constant 0 : i32
    %13 = arith.cmpi ne, %12, %c0_i32_8 : i32
    scf.if %13 {
      %c0_9 = arith.constant 0 : index
      %c0_10 = arith.constant 0 : index
      %14 = vector.load %arg9[%c0_9, %c0_10] : memref<8x128xf32, #tpu.memory_space<vmem>>, vector<8x128xf32>
      %c0_11 = arith.constant 0 : index
      %c0_12 = arith.constant 0 : index
      %15 = vector.load %arg3[%c0_11, %c0_12] : memref<1x128xf32, #tpu.memory_space<vmem>>, vector<1x128xf32>
      %16 = vector.broadcast %15 : vector<1x128xf32> to vector<8x128xf32>
      %17 = arith.addf %14, %16 : vector<8x128xf32>
      %cst_13 = arith.constant 0.000000e+00 : f32
      %18 = vector.broadcast %cst_13 : f32 to vector<8x128xf32>
      %19 = arith.maximumf %17, %18 : vector<8x128xf32>
      %20 = arith.truncf %19 : vector<8x128xf32> to vector<8x128xbf16>
      %c0_14 = arith.constant 0 : index
      %c0_15 = arith.constant 0 : index
      %21 = vector.load %arg4[%c0_14, %c0_15] : memref<128x256xf32, #tpu.memory_space<vmem>>, vector<128x256xf32>
      %22 = arith.truncf %21 : vector<128x256xf32> to vector<128x256xbf16>
      %cst_16 = arith.constant dense<0.000000e+00> : vector<8x256xf32>
      %23 = tpu.matmul %20, %22, %cst_16 {dimension_numbers = #tpu.dot_dimension_numbers<[1], [0], [0], [1], [0, 0, 1, 1], [], []>} : vector<8x128xbf16>, vector<128x256xbf16>, vector<8x256xf32> -> vector<8x256xf32>
      %c0_17 = arith.constant 0 : index
      %c0_18 = arith.constant 0 : index
      %24 = vector.load %arg5[%c0_17, %c0_18] : memref<1x256xf32, #tpu.memory_space<vmem>>, vector<1x256xf32>
      %25 = vector.broadcast %24 : vector<1x256xf32> to vector<8x256xf32>
      %26 = arith.addf %23, %25 : vector<8x256xf32>
      %27 = arith.mulf %26, %26 : vector<8x256xf32>
      %cst_19 = arith.constant dense<0.000000e+00> : vector<8xf32>
      %28 = vector.multi_reduction <add>, %27, %cst_19 [1] : vector<8x256xf32> to vector<8xf32>
      %29 = vector.shape_cast %28 : vector<8xf32> to vector<8x1xf32>
      %cst_20 = arith.constant 1.000000e-24 : f32
      %30 = vector.broadcast %cst_20 : f32 to vector<8x1xf32>
      %31 = arith.maximumf %29, %30 : vector<8x1xf32>
      %32 = math.rsqrt %31 : vector<8x1xf32>
      %33 = vector.broadcast %32 : vector<8x1xf32> to vector<8x256xf32>
      %34 = arith.mulf %26, %33 : vector<8x256xf32>
      %35 = tpu.iota {dimensions = array<i32: 0>} : vector<8x8xi32>
      %36 = tpu.iota {dimensions = array<i32: 1>} : vector<8x8xi32>
      %37 = arith.cmpi ne, %35, %36 : vector<8x8xi32>
      %c0_21 = arith.constant 0 : index
      %c0_22 = arith.constant 0 : index
      %38 = vector.load %arg6[%c0_21, %c0_22] : memref<8x1xi32, #tpu.memory_space<vmem>>, vector<8x1xi32>
      %c0_23 = arith.constant 0 : index
      %c0_24 = arith.constant 0 : index
      %39 = vector.load %arg7[%c0_23, %c0_24] : memref<1x8xi32, #tpu.memory_space<vmem>>, vector<1x8xi32>
      %40 = vector.broadcast %38 : vector<8x1xi32> to vector<8x8xi32>
      %41 = vector.broadcast %39 : vector<1x8xi32> to vector<8x8xi32>
      %42 = arith.cmpi eq, %40, %41 : vector<8x8xi32>
      %43 = arith.andi %42, %37 : vector<8x8xi1>
      %cst_25 = arith.constant 1.000000e+00 : f32
      %cst_26 = arith.constant 0.000000e+00 : f32
      %44 = vector.broadcast %cst_25 : f32 to vector<8x8xf32>
      %45 = vector.broadcast %cst_26 : f32 to vector<8x8xf32>
      %46 = arith.select %43, %44, %45 : vector<8x8xi1>, vector<8x8xf32>
      %47 = arith.extui %37 : vector<8x8xi1> to vector<8x8xi32>
      %48 = arith.sitofp %47 : vector<8x8xi32> to vector<8x8xf32>
      %cst_27 = arith.constant dense<0.000000e+00> : vector<8xf32>
      %49 = vector.multi_reduction <add>, %46, %cst_27 [1] : vector<8x8xf32> to vector<8xf32>
      %50 = vector.shape_cast %49 : vector<8xf32> to vector<8x1xf32>
      %cst_28 = arith.constant 1.000000e+00 : f32
      %51 = vector.broadcast %cst_28 : f32 to vector<8x1xf32>
      %52 = arith.addf %50, %51 : vector<8x1xf32>
      %cst_29 = arith.constant dense<0.000000e+00> : vector<8x8xf32>
      %53 = tpu.matmul %34, %34, %cst_29 {dimension_numbers = #tpu.dot_dimension_numbers<[1], [1], [0], [0], [0, 0, 1, 0], [], []>} : vector<8x256xf32>, vector<8x256xf32>, vector<8x8xf32> -> vector<8x8xf32>
      %cst_30 = arith.constant 1.000000e+01 : f32
      %54 = vector.broadcast %cst_30 : f32 to vector<8x8xf32>
      %55 = arith.mulf %53, %54 : vector<8x8xf32>
      %cst_31 = arith.constant dense<0xFF800000> : vector<8xf32>
      %56 = vector.multi_reduction <maximumf>, %55, %cst_31 [1] : vector<8x8xf32> to vector<8xf32>
      %57 = vector.shape_cast %56 : vector<8xf32> to vector<8x1xf32>
      %58 = vector.broadcast %57 : vector<8x1xf32> to vector<8x8xf32>
      %59 = arith.subf %55, %58 : vector<8x8xf32>
      %60 = math.exp %59 : vector<8x8xf32>
      %61 = arith.mulf %60, %48 : vector<8x8xf32>
      %cst_32 = arith.constant dense<0.000000e+00> : vector<8xf32>
      %62 = vector.multi_reduction <add>, %61, %cst_32 [1] : vector<8x8xf32> to vector<8xf32>
      %63 = vector.shape_cast %62 : vector<8xf32> to vector<8x1xf32>
      %64 = math.log %63 : vector<8x1xf32>
      %65 = vector.broadcast %64 : vector<8x1xf32> to vector<8x8xf32>
      %66 = arith.subf %59, %65 : vector<8x8xf32>
      %67 = arith.mulf %46, %66 : vector<8x8xf32>
      %cst_33 = arith.constant dense<0.000000e+00> : vector<8xf32>
      %68 = vector.multi_reduction <add>, %67, %cst_33 [1] : vector<8x8xf32> to vector<8xf32>
      %69 = vector.shape_cast %68 : vector<8xf32> to vector<8x1xf32>
      %70 = arith.divf %69, %52 : vector<8x1xf32>
      %71 = vector.shape_cast %70 : vector<8x1xf32> to vector<1x8x1xf32>
      %cst_34 = arith.constant dense<0.000000e+00> : vector<1xf32>
      %72 = vector.multi_reduction <add>, %71, %cst_34 [1, 2] : vector<1x8x1xf32> to vector<1xf32>
      %73 = vector.shape_cast %72 : vector<1xf32> to vector<1x1x1xf32>
      %74 = vector.extract %73[0, 0, 0] : f32 from vector<1x1x1xf32>
      %cst_35 = arith.constant 0.000000e+00 : f32
      %75 = arith.subf %cst_35, %74 : f32
      %cst_36 = arith.constant 1.250000e-01 : f32
      %76 = arith.mulf %75, %cst_36 : f32
      %c0_37 = arith.constant 0 : index
      %c0_38 = arith.constant 0 : index
      %77 = memref.load %arg8[%c0_37, %c0_38] : memref<1x1xf32, #tpu.memory_space<smem>>
      memref.store %76, %arg8[%c0_37, %c0_38] : memref<1x1xf32, #tpu.memory_space<smem>>
    } else {
    }
    return
  }
  func.func @transform_0(%arg0: i32) -> (i32, i32) {
    %c0_i32 = arith.constant 0 : i32
    %c0_i32_0 = arith.constant 0 : i32
    return %c0_i32, %arg0 : i32, i32
  }
  func.func @transform_1(%arg0: i32) -> (i32, i32) {
    %c0_i32 = arith.constant 0 : i32
    %c0_i32_0 = arith.constant 0 : i32
    return %arg0, %c0_i32 : i32, i32
  }
  func.func @transform_2(%arg0: i32) -> (i32, i32) {
    %c0_i32 = arith.constant 0 : i32
    %c0_i32_0 = arith.constant 0 : i32
    %c0_i32_1 = arith.constant 0 : i32
    return %c0_i32, %c0_i32_0 : i32, i32
  }
  func.func @transform_3(%arg0: i32) -> (i32, i32) {
    %c0_i32 = arith.constant 0 : i32
    %c0_i32_0 = arith.constant 0 : i32
    %c0_i32_1 = arith.constant 0 : i32
    return %c0_i32, %c0_i32_0 : i32, i32
  }
  func.func @transform_4(%arg0: i32) -> (i32, i32) {
    %c0_i32 = arith.constant 0 : i32
    %c0_i32_0 = arith.constant 0 : i32
    %c0_i32_1 = arith.constant 0 : i32
    return %c0_i32, %c0_i32_0 : i32, i32
  }
  func.func @transform_5(%arg0: i32) -> (i32, i32) {
    %c0_i32 = arith.constant 0 : i32
    %c0_i32_0 = arith.constant 0 : i32
    %c0_i32_1 = arith.constant 0 : i32
    return %c0_i32, %c0_i32_0 : i32, i32
  }
  func.func @transform_6(%arg0: i32) -> (i32, i32) {
    %c0_i32 = arith.constant 0 : i32
    %c0_i32_0 = arith.constant 0 : i32
    %c0_i32_1 = arith.constant 0 : i32
    return %c0_i32, %c0_i32_0 : i32, i32
  }
  func.func @transform_7(%arg0: i32) -> (i32, i32) {
    %c0_i32 = arith.constant 0 : i32
    %c0_i32_0 = arith.constant 0 : i32
    %c0_i32_1 = arith.constant 0 : i32
    return %c0_i32, %c0_i32_0 : i32, i32
  }
}

</mosaic_0001>

<bundles_post_ra>
// kernel: tpu_custom_call.1
= control target key start
LH: loop header
LB: loop body
LE: loop exit
PB: predicated region body
PF: predicated region fallthrough
CT: control target
= control target key end

     0   :  { %12 = vsyncpa [#allocation4], 0  ;;  %s1511_s0 = inlined_call_operand.hbm [shape: f32[8,1024], index: 0, kind: input, shape index: {}]   ;;  %s1512_s1 = inlined_call_operand.hbm [shape: f32[1024,128], index: 1, kind: input, shape index: {}]   ;;  %s1513_s2 = inlined_call_operand.vmem [shape: f32[1,128], index: 2, kind: input, shape index: {}]   ;;  %s1514_s3 = inlined_call_operand.hbm [shape: f32[128,256], index: 3, kind: input, shape index: {}]   ;;  %s1515_s4 = inlined_call_operand.vmem [shape: f32[1,256], index: 4, kind: input, shape index: {}]   ;;  %s1516_s5 = inlined_call_operand.vmem [shape: s32[8,1], index: 5, kind: input, shape index: {}]   ;;  %s1517_s6 = inlined_call_operand.vmem [shape: s32[1,8], index: 6, kind: input, shape index: {}]   ;;  %s1518_s7 = inlined_call_operand.hbm [shape: f32[1,1], index: 7, kind: output, shape index: {}]  }
   0x1   :  { %14 = vsyncpa [#allocation4 + $0x1], 0 }
   0x2   :  { %15 = vsyncpa [#allocation7], 0 }
   0x3   :  { %17 = vsyncpa [#allocation7 + $0x1], 0 }
   0x4   :  { %18 = vsyncpa [#allocation5], 0  ;;  %s1223_s24 = smov 0   ;;  %s1225_s25 = smov 0  }
   0x5   :  { %s1227_s26 = smov 0   ;;  %s1229_s27 = smov 0  }
   0x6 LB: > { %s1242_s28 = sadd.s32 4294967295, %s1170_s27   ;;  %p44_p0 = scmp.ne.s32.totalorder %s1162_s25, %s1158_s24  ;;  %s1170_s27 = sphi %s1229_s27, %s1534_s27   ;;  %s1166_s26 = sphi %s1227_s26, %s1533_s26   ;;  %s1162_s25 = sphi %s1225_s25, %s1532_s25   ;;  %s1158_s24 = sphi %s1223_s24, %s1531_s24  }
   0x7   : > { %p1519_p1 = scmp.eq.s32.totalorder %s1242_s28, 0  ;;  %p875_p2 = scmp.ge.s32.totalorder %s1170_s27, 1 }
   0x8   : > { %p207_p3 = scmp.lt.s32.totalorder %s1170_s27, 3  ;;  %s1172_s8 = smov [#allocation8]  }
   0x9   : > { %p1251_p5 = por %p1519_p1, %p44_p0  ;;  %s222_s9 = sshll.u32 %s1172_s8, 4  ;;  %s223_s9 = int_to_ptr.vmem [resolvable:$true] %s222_s9 }
   0xa   : > { %p1255_p6 = pnand %p875_p2, %p207_p3  ;;  %s1268_s11 = sadd.s32 1, %s1170_s27  }
   0xb   : > { %s1522_s29 = scalar_select %p1251_p5, 1, 0 }
   0xc   : > { %s1523_s30 = scalar_select %p1255_p6, 1, 0 }
   0xd   : > { %p957_p7 = pneg %p1255_p6  ;;  %s31_s12 = sadd.s32 1, %s1166_s26 }
   0xe   : > { %s28_s13 = ssub.s32 %s1170_s27, %s1268_s11  ;;  %s1024_s16 = scalar_lea.hbm %s1514_s3, 4096 }
   0xf   : > { %p1263_p8 = pnand %p957_p7, %p1519_p1  ;;  %p1025_p9 = scmp.ne.s32.totalorder %s1514_s3, %s1024_s16 }
  0x10   : > { %p1031_p13 = scmp.lt.u32.totalorder %s1024_s16, %s1514_s3 }
  0x11   : > { %p1026_p10 = pneg %p1263_p8 }
  0x13   : > { %p1027_p11 = pnand %p1026_p10, %p1025_p9 }
  0x15   : > { %p1028_p12 = pneg %p1027_p11 }
  0x17   : > { %p1033_p0 = pnand %p1031_p13, %p1028_p12 }
  0x19   : > { %1036 = shalt.err (!%p1033_p0)
}
  0x1a   : > { %s1037_s21 = scalar_lea.vmem %s223_s9, 4096  ;;  %p1045_p4 = scmp.lt.s32.totalorder %s223_s9, %s223_s9 }
  0x1b   : > { %p1038_p2 = scmp.ne.s32.totalorder %s223_s9, %s1037_s21  ;;  %p1046_p1 = scmp.lt.s32.totalorder %s1037_s21, %s1037_s21 }
  0x1d   : > { %p1040_p3 = pnand %p1038_p2, %p1026_p10  ;;  %p1047_p5 = por %p1046_p1, %p1045_p4 }
  0x1f   : > { %p1041_p7 = pneg %p1040_p3 }
  0x21   : > { %p1048_p6 = pnand %p1047_p5, %p1041_p7 }
  0x23   : > { %1051 = shalt.err (!%p1048_p6)
}
  0x24   : > { %s1173_s22 = smov 256   ;;  %s1174_s23 = smov 16  }
  0x25   : > { %960 = dma.hbm_to_vmem [thread:$0]  (!%p1263_p8), %s1514_s3, 4096, %s223_s9, [#allocation7], %s1173_s22, %s1173_s22, %s1174_s23  }
  0x26   : > { %p29_p9 = scmp.eq.s32.totalorder %s28_s13, 0  ;;  %p38_p1 = scmp.ne.s32.totalorder %s1166_s26, %s1162_s25 }
  0x27   : > { %p39_p4 = scmp.eq.s32.totalorder %s1170_s27, 0  ;;  %p969_p5 = scmp.lt.s32.totalorder %s1170_s27, 2 }
  0x28   : > { %s1294_s14 = scalar_select %p29_p9, %s1166_s26, %s31_s12  }
  0x29   : > { %p40_p6 = por %p39_p4, %p38_p1  ;;  %s1297_s15 = sand.u32 1, %s1166_s26  }
  0x2a   : > { %s878_s16 = sshll.u32 %s1297_s15, 5  ;;  %s897_s17 = sshll.u32 %s1170_s27, 9 }
  0x2b   : > { %s1304_s19 = scalar_lea.hbm %s1511_s0, %s897_s17  ;;  %s249_s9 = scalar_lea.vmem [#allocation3], %s878_s16 }
  0x2c   : > { %s257_s12 = sshll.u32 %s249_s9, 4  ;;  %p1308_p8 = pnand %p969_p5, %p40_p6  ;;  %s1306_s12 = int_to_ptr.vmem [resolvable:$true] %s257_s12 }
  0x2d   : > { %s881_s20 = sshll.u32 %s1297_s15, 9  ;;  %s264_s21 = sand.u32 1, %s1170_s27  }
  0x2e   : > { %s246_s22 = scalar_lea.sflag [#allocation4], %s1297_s15  ;;  %s1052_s23 = scalar_lea.hbm %s1304_s19, 512 }
  0x2f   : > { %p1053_p10 = scmp.ne.s32.totalorder %s1304_s19, %s1052_s23  ;;  %p1054_p11 = pneg %p1308_p8 }
  0x30   : > { %s1057_s16 = scalar_lea.hbm %s1511_s0, 1024  ;;  %p1058_p0 = scmp.lt.u32.totalorder %s1304_s19, %s1511_s0 }
  0x31   : > { %p1055_p12 = pnand %p1054_p11, %p1053_p10  ;;  %p1059_p2 = scmp.lt.u32.totalorder %s1057_s16, %s1052_s23 }
  0x32   : > { %p1061_p7 = scmp.lt.u32.totalorder %s1052_s23, %s1304_s19 }
  0x33   : > { %p1056_p13 = pneg %p1055_p12  ;;  %p1060_p3 = por %p1059_p2, %p1058_p0 }
  0x35   : > { %p1062_p9 = por %p1061_p7, %p1060_p3 }
  0x37   : > { %p1063_p1 = pnand %p1062_p9, %p1056_p13 }
  0x39   : > { %1066 = shalt.err (!%p1063_p1)
}
  0x3a   : > { %s1067_s18 = scalar_lea.vmem %s1306_s12, 512  ;;  %s1175_s9 = smov [#allocation3]  }
  0x3b   : > { %p1068_p4 = scmp.ne.s32.totalorder %s1306_s12, %s1067_s18  ;;  %s1072_s24 = sshll.u32 %s1175_s9, 4  ;;  %s1073_s24 = int_to_ptr.vmem [resolvable:$false] %s1072_s24 }
  0x3c   : > { %s1074_s8 = scalar_lea.vmem %s1073_s24, 1024  ;;  %p1075_p10 = scmp.lt.s32.totalorder %s1306_s12, %s1073_s24 }
  0x3d   : > { %p1070_p5 = pnand %p1068_p4, %p1054_p11  ;;  %p1076_p12 = scmp.lt.s32.totalorder %s1074_s8, %s1067_s18 }
  0x3f   : > { %p1071_p6 = pneg %p1070_p5  ;;  %p1077_p0 = por %p1076_p12, %p1075_p10 }
  0x41   : > { %p1078_p2 = pnand %p1077_p0, %p1071_p6 }
  0x43   : > { %1081 = shalt.err (!%p1078_p2)
}
  0x44   : > { %964 = dma.hbm_to_vmem [thread:$0]  (!%p1308_p8), %s1304_s19, 512, %s1306_s12, %s246_s22  }
  0x45   : > { %s268_s23 = scalar_lea.vmem [#allocation6], %s881_s20  ;;  %s898_s17 = sshll.u32 %s1170_s27, 13 }
  0x46   : > { %s275_s16 = sshll.u32 %s268_s23, 4  ;;  %s1348_s9 = scalar_lea.hbm %s1512_s1, %s898_s17  ;;  %s1342_s16 = int_to_ptr.vmem [resolvable:$true] %s275_s16 }
  0x47   : > { %s1352_s24 = scalar_lea.sflag [#allocation7], %s264_s21  ;;  %s1082_s8 = scalar_lea.hbm %s1348_s9, 8192 }
  0x48   : > { %p1083_p13 = scmp.ne.s32.totalorder %s1348_s9, %s1082_s8  ;;  %s1087_s12 = scalar_lea.hbm %s1512_s1, 16384 }
  0x49   : > { %p1088_p9 = scmp.lt.u32.totalorder %s1348_s9, %s1512_s1  ;;  %p1089_p1 = scmp.lt.u32.totalorder %s1087_s12, %s1082_s8 }
  0x4a   : > { %p1085_p3 = pnand %p1083_p13, %p1054_p11  ;;  %p1091_p5 = scmp.lt.u32.totalorder %s1082_s8, %s1348_s9 }
  0x4b   : > { %p1090_p4 = por %p1089_p1, %p1088_p9 }
  0x4c   : > { %p1086_p7 = pneg %p1085_p3 }
  0x4d   : > { %p1092_p6 = por %p1091_p5, %p1090_p4 }
  0x4f   : > { %p1093_p10 = pnand %p1092_p6, %p1086_p7 }
  0x51   : > { %1096 = shalt.err (!%p1093_p10)
}
  0x52   : > { %s1097_s27 = scalar_lea.vmem %s1342_s16, 8192  ;;  %s1176_s21 = smov [#allocation6]  }
  0x53   : > { %p1098_p12 = scmp.ne.s32.totalorder %s1342_s16, %s1097_s27  ;;  %s1102_s23 = sshll.u32 %s1176_s21, 4  ;;  %s1103_s23 = int_to_ptr.vmem [resolvable:$false] %s1102_s23 }
  0x54   : > { %s1104_s17 = scalar_lea.vmem %s1103_s23, 16384  ;;  %p1105_p13 = scmp.lt.s32.totalorder %s1342_s16, %s1103_s23 }
  0x55   : > { %p1100_p0 = pnand %p1098_p12, %p1054_p11  ;;  %p1106_p3 = scmp.lt.s32.totalorder %s1104_s17, %s1097_s27 }
  0x57   : > { %p1101_p2 = pneg %p1100_p0  ;;  %p1107_p9 = por %p1106_p3, %p1105_p13 }
  0x59   : > { %p1108_p1 = pnand %p1107_p9, %p1101_p2 }
  0x5b   : > { %1111 = shalt.err (!%p1108_p1)
}
  0x5c   : > { %s1177_s10 = smov 128   ;;  %s1178_s18 = smov 8  }
  0x5d   : > { %967 = dma.hbm_to_vmem [thread:$0]  (!%p1308_p8), %s1348_s9, 8192, %s1342_s16, %s1352_s24, %s1177_s10, %s1177_s10, %s1178_s18  }
  0x5e   : > { %p1526_p11 = scmp.ne.s32.totalorder %s1523_s30, 0 }
  0x5f   : > { %s289_s8 = sand.u32 (!%p1526_p11), 1, %s1162_s25   ;;  %p1527_p7 = scmp.ne.s32.totalorder (!%p1526_p11), %s1522_s29, 0 }
  0x60   : > { %287 = sbr.rel (%p1526_p11) target bundleno = 1676 (0x68c), region = 48  ;;  %s885_s15 = sshll.u32 (!%p1526_p11), %s289_s8, 5 }
  0x61   : > { %s290_s19 = scalar_lea.sflag (!%p1526_p11), [#allocation4], %s289_s8  ;;  %s1381_s12 = scalar_lea.vmem (!%p1526_p11), [#allocation3], %s885_s15 }
  0x67   : > { %1141 = dma.done.wait (%p1527_p7), %s290_s19, 512  }
  0x68   : > { %1143 = vsyncadd (%p1527_p7), %s290_s19, 4294966784  ;;  %s298_s20 = sand.u32 1, %s1242_s28   ;;  %s886_s13 = sshll.u32 %s289_s8, 9 }
  0x69   : > { %s299_s16 = scalar_lea.sflag [#allocation7], %s298_s20  ;;  %s1388_s9 = scalar_lea.vmem [#allocation6], %s886_s13 }
  0x6a   : > { %1145 = dma.done.wait (%p1527_p7), %s299_s16, 8192  }
  0x6b   : > { %1147 = vsyncadd (%p1527_p7), %s299_s16, 4294959104  ;;  %p1528_p8 = scmp.eq.s32.totalorder %s1242_s28, 0 }
  0x6d   : > { %1149 = dma.done.wait (%p1528_p8), [#allocation7], 4096   ;;  %p1529_p4 = pmov %p1528_p8 }
  0x6e   : > { %p1530_p5 = scmp.ne.s32.totalorder %s1242_s28, 0 }
  0x6f   : > { %1151 = vsyncadd (%p1529_p4), [#allocation7], 4294963200  ;;  %v1179_v0 = vmov (!%p1530_p5), 0.0  }
  0x70   : > { %343 = sbr.rel (%p1530_p5) target bundleno = 119 (0x77), region = 64  ;;  %344 = vst [vmem:[#allocation2] sm:$0xff] (!%p1530_p5), %v1179_v0 }
  0x77 PF: > { %v370_v1 = vld [vmem:[%s1388_s9 + $0x80] sm:$0xff]  ;;  %v371_v2 = vld [vmem:[%s1388_s9 + $0x88] sm:$0xff]  ;;  %v372_v12 = vld [vmem:[%s1388_s9 + $0x90] sm:$0xff]  ;;  %p889_p6 = scmp.ne.s32.totalorder %s1242_s28, 1 }
  0x78   : > { %v402_v3 = vld [vmem:[%s1388_s9 + $0x180] sm:$0xff]  ;;  %v426_v4 = vpack.c.bf16 %v371_v2, %v370_v1  ;;  %v403_v5 = vld [vmem:[%s1388_s9 + $0x188] sm:$0xff]  ;;  %v373_v14 = vld [vmem:[%s1388_s9 + $0x98] sm:$0xff]  ;;  %vm676_vm0 = vcmask (!%p889_p6), 64512   ;;  %vm771_vm4 = vcmask (!%p889_p6), 7168  }
  0x79   : > { %v354_v6 = vld [vmem:[%s1388_s9] sm:$0xff]  ;;  %v355_v7 = vld [vmem:[%s1388_s9 + $0x8] sm:$0xff]  ;;  %v442_v8 = vpack.c.bf16 %v403_v5, %v402_v3  ;;  %v404_v15 = vld [vmem:[%s1388_s9 + $0x190] sm:$0xff]  ;;  %v427_v17 = vpack.c.bf16 %v373_v14, %v372_v12 }
  0x7a   : > { %v418_v9 = vpack.c.bf16 %v355_v7, %v354_v6  ;;  %v386_v10 = vld [vmem:[%s1388_s9 + $0x100] sm:$0xff]  ;;  %v387_v11 = vld [vmem:[%s1388_s9 + $0x108] sm:$0xff]  ;;  %899 = vmatprep.subr.bf16.mxu0 %v426_v4  ;;  %v405_v16 = vld [vmem:[%s1388_s9 + $0x198] sm:$0xff] }
  0x7b   : > { %v434_v13 = vpack.c.bf16 %v387_v11, %v386_v10  ;;  %921 = vmatprep.subr.bf16.mxu1 %v442_v8  ;;  %v443_v18 = vpack.c.bf16 %v405_v16, %v404_v15  ;;  %v356_v19 = vld [vmem:[%s1388_s9 + $0x10] sm:$0xff]  ;;  %v357_v20 = vld [vmem:[%s1388_s9 + $0x18] sm:$0xff]  ;;  %v374_v24 = vld [vmem:[%s1388_s9 + $0xa0] sm:$0xff] }
  0x7c   : > { %900 = vmatpush3.bf16.msra.mxu0 %v418_v9  ;;  %v388_v21 = vld [vmem:[%s1388_s9 + $0x110] sm:$0xff]  ;;  %v419_v22 = vpack.c.bf16 %v357_v20, %v356_v19  ;;  %v389_v23 = vld [vmem:[%s1388_s9 + $0x118] sm:$0xff]  ;;  %v375_v25 = vld [vmem:[%s1388_s9 + $0xa8] sm:$0xff] }
  0x7d   : > { %922 = vmatpush3.bf16.msra.mxu1 %v434_v13  ;;  %901 = vmatprep.subr.bf16.mxu0 %v427_v17  ;;  %v435_v26 = vpack.c.bf16 %v389_v23, %v388_v21  ;;  %v428_v27 = vpack.c.bf16 %v375_v25, %v374_v24  ;;  %v406_v28 = vld [vmem:[%s1388_s9 + $0x1a0] sm:$0xff]  ;;  %v407_v29 = vld [vmem:[%s1388_s9 + $0x1a8] sm:$0xff]  ;;  %v376_v36 = vld [vmem:[%s1388_s9 + $0xb0] sm:$0xff] }
  0x7e   : > { %923 = vmatprep.subr.bf16.mxu1 %v443_v18  ;;  %v358_v30 = vld [vmem:[%s1388_s9 + $0x20] sm:$0xff]  ;;  %v444_v31 = vpack.c.bf16 %v407_v29, %v406_v28  ;;  %v359_v32 = vld [vmem:[%s1388_s9 + $0x28] sm:$0xff]  ;;  %v377_v37 = vld [vmem:[%s1388_s9 + $0xb8] sm:$0xff] }
  0x7f   : > { %v390_v33 = vld [vmem:[%s1388_s9 + $0x120] sm:$0xff]  ;;  %v391_v34 = vld [vmem:[%s1388_s9 + $0x128] sm:$0xff]  ;;  %v420_v35 = vpack.c.bf16 %v359_v32, %v358_v30  ;;  %v408_v38 = vld [vmem:[%s1388_s9 + $0x1b0] sm:$0xff]  ;;  %v429_v40 = vpack.c.bf16 %v377_v37, %v376_v36 }
  0x80   : > { %902 = vmatpush3.bf16.msra.mxu0 %v419_v22  ;;  %v436_v39 = vpack.c.bf16 %v391_v34, %v390_v33  ;;  %v409_v41 = vld [vmem:[%s1388_s9 + $0x1b8] sm:$0xff]  ;;  %v360_v42 = vld [vmem:[%s1388_s9 + $0x30] sm:$0xff]  ;;  %v378_v47 = vld [vmem:[%s1388_s9 + $0xc0] sm:$0xff] }
  0x81   : > { %924 = vmatpush3.bf16.msra.mxu1 %v435_v26  ;;  %903 = vmatprep.subr.bf16.mxu0 %v428_v27  ;;  %v361_v43 = vld [vmem:[%s1388_s9 + $0x38] sm:$0xff]  ;;  %v445_v44 = vpack.c.bf16 %v409_v41, %v408_v38  ;;  %v392_v45 = vld [vmem:[%s1388_s9 + $0x130] sm:$0xff]  ;;  %v379_v48 = vld [vmem:[%s1388_s9 + $0xc8] sm:$0xff] }
  0x82   : > { %925 = vmatprep.subr.bf16.mxu1 %v444_v31  ;;  %v393_v46 = vld [vmem:[%s1388_s9 + $0x138] sm:$0xff]  ;;  %v410_v49 = vld [vmem:[%s1388_s9 + $0x1c0] sm:$0xff]  ;;  %v411_v50 = vld [vmem:[%s1388_s9 + $0x1c8] sm:$0xff]  ;;  %v421_v51 = vpack.c.bf16 %v361_v43, %v360_v42  ;;  %v430_v53 = vpack.c.bf16 %v379_v48, %v378_v47 }
  0x83   : > { %v437_v52 = vpack.c.bf16 %v393_v46, %v392_v45  ;;  %v362_v54 = vld [vmem:[%s1388_s9 + $0x40] sm:$0xff]  ;;  %v363_v55 = vld [vmem:[%s1388_s9 + $0x48] sm:$0xff]  ;;  %v446_v57 = vpack.c.bf16 %v411_v50, %v410_v49  ;;  %v380_v59 = vld [vmem:[%s1388_s9 + $0xd0] sm:$0xff] }
  0x84   : > { %904 = vmatpush3.bf16.msra.mxu0 %v420_v35  ;;  %v394_v56 = vld [vmem:[%s1388_s9 + $0x140] sm:$0xff]  ;;  %v395_v58 = vld [vmem:[%s1388_s9 + $0x148] sm:$0xff]  ;;  %v381_v60 = vld [vmem:[%s1388_s9 + $0xd8] sm:$0xff]  ;;  %v422_v63 = vpack.c.bf16 %v363_v55, %v362_v54 }
  0x85   : > { %926 = vmatpush3.bf16.msra.mxu1 %v436_v39  ;;  %905 = vmatprep.subr.bf16.mxu0 %v429_v40  ;;  %v412_v61 = vld [vmem:[%s1388_s9 + $0x1d0] sm:$0xff]  ;;  %v413_v62 = vld [vmem:[%s1388_s9 + $0x1d8] sm:$0xff]  ;;  %v438_v0 = vpack.c.bf16 %v395_v58, %v394_v56  ;;  %v431_v1 = vpack.c.bf16 %v381_v60, %v380_v59  ;;  %v382_v7 = vld [vmem:[%s1388_s9 + $0xe0] sm:$0xff] }
  0x86   : > { %927 = vmatprep.subr.bf16.mxu1 %v445_v44  ;;  %v364_v2 = vld [vmem:[%s1388_s9 + $0x50] sm:$0xff]  ;;  %v365_v3 = vld [vmem:[%s1388_s9 + $0x58] sm:$0xff]  ;;  %v447_v5 = vpack.c.bf16 %v413_v62, %v412_v61  ;;  %v383_v8 = vld [vmem:[%s1388_s9 + $0xe8] sm:$0xff]  ;;  %v1180_v61 = vmov (!%p889_p6), 0  }
  0x87   : > { %v396_v4 = vld [vmem:[%s1388_s9 + $0x150] sm:$0xff]  ;;  %v397_v6 = vld [vmem:[%s1388_s9 + $0x158] sm:$0xff]  ;;  %v414_v9 = vld [vmem:[%s1388_s9 + $0x1e0] sm:$0xff]  ;;  %v423_v11 = vpack.c.bf16 %v365_v3, %v364_v2  ;;  %v432_v15 = vpack.c.bf16 %v383_v8, %v382_v7  ;;  %1014 = vset.pattern.permute.xlu1 (!%p889_p6), %v1180_v61  ;;  %1015 = vset.pattern.permute.xlu0 (!%p889_p6), %v1180_v61 }
  0x88   : > { %906 = vmatpush3.bf16.msra.mxu0 %v421_v51  ;;  %v415_v10 = vld [vmem:[%s1388_s9 + $0x1e8] sm:$0xff]  ;;  %v366_v12 = vld [vmem:[%s1388_s9 + $0x60] sm:$0xff]  ;;  %v439_v14 = vpack.c.bf16 %v397_v6, %v396_v4  ;;  %v349_v18 = vld [vmem:[%s1381_s12 + $0x18] sm:$0xff] }
  0x89   : > { %928 = vmatpush3.bf16.msra.mxu1 %v437_v52  ;;  %907 = vmatprep.subr.bf16.mxu0 %v430_v53  ;;  %v367_v13 = vld [vmem:[%s1388_s9 + $0x68] sm:$0xff]  ;;  %v398_v16 = vld [vmem:[%s1388_s9 + $0x160] sm:$0xff]  ;;  %v448_v19 = vpack.c.bf16 %v415_v10, %v414_v9  ;;  %v384_v21 = vld [vmem:[%s1388_s9 + $0xf0] sm:$0xff]  ;;  %v353_v24 = vpack.c.bf16 %v349_v18, %v349_v18 }
  0x8a   : > { %929 = vmatprep.subr.bf16.mxu1 %v446_v57  ;;  %v347_v17 = vld [vmem:[%s1381_s12 + $0x8] sm:$0xff]  ;;  %v385_v22 = vld [vmem:[%s1388_s9 + $0xf8] sm:$0xff]  ;;  %v416_v25 = vld [vmem:[%s1388_s9 + $0x1f0] sm:$0xff]  ;;  %v424_v27 = vpack.c.bf16 %v367_v13, %v366_v12 }
  0x8b   : > { %v399_v20 = vld [vmem:[%s1388_s9 + $0x168] sm:$0xff]  ;;  %v351_v23 = vpack.c.bf16 %v347_v17, %v347_v17  ;;  %v417_v26 = vld [vmem:[%s1388_s9 + $0x1f8] sm:$0xff]  ;;  %v433_v29 = vpack.c.bf16 %v385_v22, %v384_v21  ;;  %v368_v30 = vld [vmem:[%s1388_s9 + $0x70] sm:$0xff]  ;;  %522 = vmatprep.mubr.bf16.mxu1 %v353_v24 }
  0x8c   : > { %908 = vmatpush3.bf16.msra.mxu0 %v422_v63  ;;  %v440_v28 = vpack.c.bf16 %v399_v20, %v398_v16  ;;  %v369_v31 = vld [vmem:[%s1388_s9 + $0x78] sm:$0xff]  ;;  %v449_v32 = vpack.c.bf16 %v417_v26, %v416_v25  ;;  %v400_v33 = vld [vmem:[%s1388_s9 + $0x170] sm:$0xff]  ;;  %v346_v36 = vld [vmem:[%s1381_s12] sm:$0xff] }
  0x8d   : > { %930 = vmatpush3.bf16.msra.mxu1 %v438_v0  ;;  %909 = vmatprep.subr.bf16.mxu0 %v431_v1  ;;  %v401_v34 = vld [vmem:[%s1388_s9 + $0x178] sm:$0xff]  ;;  %v425_v35 = vpack.c.bf16 %v369_v31, %v368_v30  ;;  %v348_v38 = vld [vmem:[%s1381_s12 + $0x10] sm:$0xff]  ;;  %v350_v39 = vpack.c.bf16 %v346_v36, %v346_v36  ;;  %v548_v54 = vld [vmem:[#allocation8 + $0x8] sm:$0xff] (!%p889_p6) }
  0x8e   : > { %931 = vmatprep.subr.bf16.mxu1 %v447_v5  ;;  %482 = vmatprep.mubr.bf16.mxu0 %v351_v23  ;;  %v441_v37 = vpack.c.bf16 %v401_v34, %v400_v33  ;;  %v352_v40 = vpack.c.bf16 %v348_v38, %v348_v38  ;;  %v345_v50 = vld [vmem:[#allocation2] sm:$0xff]  ;;  %v547_v56 = vld [vmem:[#allocation8] sm:$0xff] (!%p889_p6)  ;;  %v549_v58 = vld [vmem:[#allocation8 + $0x10] sm:$0xff] (!%p889_p6) }
  0x8f   : > { %v550_v55 = vld [vmem:[#allocation8 + $0x18] sm:$0xff] (!%p889_p6)  ;;  %v552_v59 = vld [vmem:[#allocation8 + $0x28] sm:$0xff] (!%p889_p6)  ;;  %v579_v62 = vpack.c.bf16 (!%p889_p6), %v549_v58, %v547_v56  ;;  %v551_v0 = vld [vmem:[#allocation8 + $0x20] sm:$0xff] (!%p889_p6) }
  0x90   : > { %910 = vmatpush3.bf16.msra.mxu0 %v423_v11  ;;  %v580_v57 = vpack.c.bf16 (!%p889_p6), %v550_v55, %v548_v54  ;;  %v554_v60 = vld [vmem:[#allocation8 + $0x38] sm:$0xff] (!%p889_p6)  ;;  %v553_v1 = vld [vmem:[#allocation8 + $0x30] sm:$0xff] (!%p889_p6)  ;;  %v556_v2 = vld [vmem:[#allocation8 + $0x48] sm:$0xff] (!%p889_p6) }
  0x91   : > { %932 = vmatpush3.bf16.msra.mxu1 %v439_v14  ;;  %911 = vmatprep.subr.bf16.mxu0 %v432_v15  ;;  %v582_v63 = vpack.c.bf16 (!%p889_p6), %v554_v60, %v552_v59  ;;  %v558_v3 = vld [vmem:[#allocation8 + $0x58] sm:$0xff] (!%p889_p6)  ;;  %v581_v4 = vpack.c.bf16 (!%p889_p6), %v553_v1, %v551_v0  ;;  %v555_v6 = vld [vmem:[#allocation8 + $0x40] sm:$0xff] (!%p889_p6)  ;;  %v557_v7 = vld [vmem:[#allocation8 + $0x50] sm:$0xff] (!%p889_p6) }
  0x92   : > { %933 = vmatprep.subr.bf16.mxu1 %v448_v19  ;;  %v584_v5 = vpack.c.bf16 (!%p889_p6), %v558_v3, %v556_v2  ;;  %v560_v8 = vld [vmem:[#allocation8 + $0x68] sm:$0xff] (!%p889_p6)  ;;  %v562_v9 = vld [vmem:[#allocation8 + $0x78] sm:$0xff] (!%p889_p6)  ;;  %v583_v10 = vpack.c.bf16 (!%p889_p6), %v557_v7, %v555_v6  ;;  %v559_v12 = vld [vmem:[#allocation8 + $0x60] sm:$0xff] (!%p889_p6) }
  0x93   : > { %v586_v11 = vpack.c.bf16 (!%p889_p6), %v562_v9, %v560_v8  ;;  %v561_v13 = vld [vmem:[#allocation8 + $0x70] sm:$0xff] (!%p889_p6)  ;;  %v564_v14 = vld [vmem:[#allocation8 + $0x88] sm:$0xff] (!%p889_p6)  ;;  %v566_v15 = vld [vmem:[#allocation8 + $0x98] sm:$0xff] (!%p889_p6)  ;;  %v1181_v9 = vmov (!%p889_p6), 0.0  }
  0x94   : > { %912 = vmatpush3.bf16.msra.mxu0 %v424_v27  ;;  %v585_v16 = vpack.c.bf16 (!%p889_p6), %v561_v13, %v559_v12  ;;  %v588_v17 = vpack.c.bf16 (!%p889_p6), %v566_v15, %v564_v14  ;;  %v563_v18 = vld [vmem:[#allocation8 + $0x80] sm:$0xff] (!%p889_p6)  ;;  %v565_v19 = vld [vmem:[#allocation8 + $0x90] sm:$0xff] (!%p889_p6)  ;;  %v568_v20 = vld [vmem:[#allocation8 + $0xa8] sm:$0xff] (!%p889_p6) }
  0x95   : > { %934 = vmatpush3.bf16.msra.mxu1 %v440_v28  ;;  %913 = vmatprep.subr.bf16.mxu0 %v433_v29  ;;  %v570_v21 = vld [vmem:[#allocation8 + $0xb8] sm:$0xff] (!%p889_p6)  ;;  %v587_v22 = vpack.c.bf16 (!%p889_p6), %v565_v19, %v563_v18  ;;  %v567_v24 = vld [vmem:[#allocation8 + $0xa0] sm:$0xff] (!%p889_p6)  ;;  %v569_v25 = vld [vmem:[#allocation8 + $0xb0] sm:$0xff] (!%p889_p6) }
  0x96   : > { %935 = vmatprep.subr.bf16.mxu1 %v449_v32  ;;  %v590_v23 = vpack.c.bf16 (!%p889_p6), %v570_v21, %v568_v20  ;;  %v572_v26 = vld [vmem:[#allocation8 + $0xc8] sm:$0xff] (!%p889_p6)  ;;  %v574_v27 = vld [vmem:[#allocation8 + $0xd8] sm:$0xff] (!%p889_p6)  ;;  %v589_v28 = vpack.c.bf16 (!%p889_p6), %v569_v25, %v567_v24  ;;  %v571_v32 = vld [vmem:[#allocation8 + $0xc0] sm:$0xff] (!%p889_p6) }
  0x97   : > { %v890_v30 = vld [vmem:[%s1513_s2] ss:$0 sm:$0xff] (!%p889_p6)  ;;  %v592_v31 = vpack.c.bf16 (!%p889_p6), %v574_v27, %v572_v26  ;;  %v573_v33 = vld [vmem:[#allocation8 + $0xd0] sm:$0xff] (!%p889_p6)  ;;  %v576_v34 = vld [vmem:[#allocation8 + $0xe8] sm:$0xff] (!%p889_p6) }
  0x98   : > { %914 = vmatpush3.bf16.msra.mxu0 %v425_v35  ;;  %v578_v35 = vld [vmem:[#allocation8 + $0xf8] sm:$0xff] (!%p889_p6) }
  0x99   : > { %936 = vmatpush3.bf16.msra.mxu1 %v441_v37  ;;  %607 = vmatprep.subr.bf16.mxu0 (!%p889_p6), %v580_v57  ;;  %v591_v37 = vpack.c.bf16 (!%p889_p6), %v573_v33, %v571_v32  ;;  %v594_v38 = vpack.c.bf16 (!%p889_p6), %v578_v35, %v576_v34  ;;  %v662_v14 = vld [vmem:[%s1516_s5] sm:$0xff] (!%p889_p6) }
  0x9b   : > { %483 = vmatmul.mubr.bf16.vlgmr.msra.gmra.mrb[0].mxu0 %v350_v39  ;;  %v575_v39 = vld [vmem:[#allocation8 + $0xe0] sm:$0xff] (!%p889_p6) }
  0x9c   : > { %523 = vmatmul.mubr.bf16.vlgmr.msra.gmra.mrb[0].mxu1 %v352_v40  ;;  %639 = vmatprep.mubr.bf16.mxu0 (!%p889_p6), %v1180_v61  ;;  %v577_v40 = vld [vmem:[#allocation8 + $0xf0] sm:$0xff] (!%p889_p6) }
  0x9d   : > { %608 = vmatpush1.bf16.msra.mxu0 (!%p889_p6), %v579_v62 }
  0x9e   : > { %609 = vmatprep.subr.bf16.mxu0 (!%p889_p6), %v582_v63 }
  0xa1   : > { %610 = vmatpush1.bf16.msra.mxu0 (!%p889_p6), %v581_v4 }
  0xa2   : > { %611 = vmatprep.subr.bf16.mxu0 (!%p889_p6), %v584_v5 }
  0xa5   : > { %612 = vmatpush1.bf16.msra.mxu0 (!%p889_p6), %v583_v10 }
  0xa6   : > { %613 = vmatprep.subr.bf16.mxu0 (!%p889_p6), %v586_v11 }
  0xa9   : > { %614 = vmatpush1.bf16.msra.mxu0 (!%p889_p6), %v585_v16  ;;  %v891_v16 = vld [vmem:[%s1517_s6] ss:$0 sm:$0xff] (!%p889_p6) }
  0xaa   : > { %615 = vmatprep.subr.bf16.mxu0 (!%p889_p6), %v588_v17 }
  0xad   : > { %616 = vmatpush1.bf16.msra.mxu0 (!%p889_p6), %v587_v22 }
  0xae   : > { %617 = vmatprep.subr.bf16.mxu0 (!%p889_p6), %v590_v23 }
  0xb1   : > { %618 = vmatpush1.bf16.msra.mxu0 (!%p889_p6), %v589_v28 }
  0xb2   : > { %619 = vmatprep.subr.bf16.mxu0 (!%p889_p6), %v592_v31 }
  0xb5   : > { %620 = vmatpush1.bf16.msra.mxu0 (!%p889_p6), %v591_v37 }
  0xb6   : > { %621 = vmatprep.subr.bf16.mxu0 (!%p889_p6), %v594_v38 }
 0x16e   : > { %v915_v41 = vpop.f32.mrb[0].mxu0 }
 0x16f   : > { %v937_v42 = vpop.f32.mrb[0].mxu1  ;;  %v916_v43 = vpop.f32.mrb[1].mxu0 }
 0x170   : > { %v917_v44 = vadd.f32 %v916_v43, %v915_v41  ;;  %v938_v45 = vpop.f32.mrb[1].mxu1  ;;  %v918_v46 = vpop.f32.mrb[2].mxu0 }
 0x171   : > { %v939_v47 = vadd.f32 %v938_v45, %v937_v42  ;;  %v940_v48 = vpop.f32.mrb[2].mxu1  ;;  %v919_v49 = vpop.f32.mrb[3].mxu0  ;;  %535 = sbr.rel (%p889_p6) target bundleno = 1661 (0x67d), region = 68  ;;  %v593_v42 = vpack.c.bf16 (!%p889_p6), %v577_v40, %v575_v39 }
 0x172   : > { %v941_v51 = vpop.f32.mrb[3].mxu1 }
 0x173   : > { %v525_v52 = vadd.f32 %v939_v47, %v917_v44  ;;  %622 = vmatpush1.bf16.msra.mxu0 (!%p889_p6), %v593_v42  ;;  %v597_v44 = vlaneseq (!%p889_p6)  ;;  %v595_v47 = vld [vmem:[%s1515_s4] sm:$0x3] (!%p889_p6) }
 0x175   : > { %v530_v53 = vadd.f32 %v525_v52, %v345_v50  ;;  %v598_v45 = vshrl.u32 (!%p889_p6), %v597_v44, 7  ;;  %v660_v8 = vand.u32 (!%p889_p6), 127, %v597_v44 }
 0x177   : > { %531 = vst [vmem:[#allocation2] sm:$0xff] %v530_v53  ;;  %v599_v46 = vsub.s32 (!%p889_p6), 0, %v598_v45  ;;  %v603_v48 = vsub.s32 (!%p889_p6), 1, %v598_v45  ;;  %vm661_vm1 = vcmp.ne.s32.totalorder (!%p889_p6), %v598_v45, %v660_v8 }
 0x178   : > { %v892_v10 = vsel %vm661_vm1, 1.0, %v1181_v9 }
 0x179   : > { %v600_v49 = vrot.slane %v595_v47, %v599_v46  ;;  %v604_v50 = vrot.slane %v595_v47, %v603_v48 }
 0x17e   : > { %v536_v29 = vld [vmem:[#allocation2] sm:$0xff] }
 0x17f   : > { %v544_v36 = vadd.f32 %v890_v30, %v536_v29 }
 0x181   : > { %v545_v41 = vmax.f32 %v544_v36, 0.0 }
 0x183   : > { %v546_v43 = vpack.c.bf16 %v545_v41, %v545_v41 }
 0x185   : > { %640 = vmatmul.mubr.bf16.vlgmr.msra.gmra.mrb[0].mxu0 %v546_v43 }
 0x258   : > { %v641_v51 = vpop.f32.mrb[0].mxu0 }
 0x259   : > { %v642_v52 = vadd.f32 %v641_v51, %v600_v49  ;;  %v643_v53 = vpop.f32.mrb[1].mxu0 }
 0x25a   : > { %v644_v54 = vadd.f32 %v643_v53, %v604_v50  ;;  %v645_v55 = vpop.f32.mrb[2].mxu0 }
 0x25b   : > { %v646_v56 = vpop.f32.mrb[3].mxu0  ;;  %v648_v57 = vmul.f32 %v642_v52, %v642_v52 }
 0x25c   : > { %v649_v58 = vmul.f32 %v644_v54, %v644_v54 }
 0x25e   : > { %v650_v59 = vadd.f32 %v649_v58, %v648_v57 }
 0x260   : > { %651 = vadd.xlane.f32.xlu0 %v650_v59 }
 0x2ed   : > { %v652_v60 = vpop.xlane.xlu0 %651 }
 0x2ee   : > { %v653_v61 = vmax.f32 %v652_v60, 1e-24 }
 0x2f0   : > { %1016 = vrsqrt.f32 %v653_v61 }
 0x2fa   : > { %v1017_v62 = vpop.eup %1016 }
 0x2fb   : > { %v656_v63 = vmul.f32 %v1017_v62, %v644_v54  ;;  %v655_v0 = vmul.f32 %v1017_v62, %v642_v52 }
 0x2fd   : > { %681 = vmatprep.subr.mxu1 %v656_v63  ;;  %745 = vmatprep.mubr.f32.mxu1 %v656_v63 }
 0x2fe   : > { %682 = vmatpush1.xpose.msra.mxu1 %v655_v0 }
 0x301   : > { %746 = vmatmul.mubr.f32.vlgmr.msra.gmra.mrb[0].mxu1 %v655_v0 }
 0x3d4   : > { %v747_v1 = vpop.f32.mrb[0].mxu1 }
 0x3d5   : > { %v751_v2 = vmul.f32 10.0, %v747_v1  ;;  %v749_v3 = vpop.f32.mrb[1].mxu1 }
 0x3d7   : > { %v752_v4 = vsel %vm676_vm0, %v751_v2, -inf }
 0x3d8   : > { %753 = vmax.xlane.f32.xlu0 %v752_v4 }
 0x465   : > { %v754_v5 = vpop.xlane.xlu0 %753 }
 0x466   : > { %v755_v6 = vsub.f32 %v751_v2, %v754_v5 }
 0x468   : > { %v756_v7 = vmul.f32 1.442695, %v755_v6 }
 0x46a   : > { %1018 = vpow2.f32 %v756_v7 }
 0x474   : > { %v1019_v11 = vpop.eup %1018 }
 0x475   : > { %v758_v12 = vmul.f32 %v1019_v11, %v892_v10 }
 0x477   : > { %v759_v13 = vsel %vm676_vm0, %v758_v12, 0.0 }
 0x478   : > { %760 = vadd.xlane.f32.xlu1 %v759_v13 }
 0x489   : > { %665 = vperm.xlu1 %1014, %v662_v14  }
 0x505   : > { %v761_v15 = vpop.xlane.xlu1 %760 }
 0x506   : > { %1020 = vlog2.f32 %v761_v15 }
 0x509   : > { %v666_v17 = vpop.permute.xlu1 %665 }
 0x50a   : > { %vm671_vm2 = vcmp.eq.s32.totalorder %v666_v17, %v891_v16 }
 0x50b   : > { %vm672_vm3 = vmand %vm671_vm2, %vm661_vm1 }
 0x50c   : > { %v673_v18 = vsel %vm672_vm3, 1.0, %v1181_v9 }
 0x50d   : > { %v677_v19 = vsel %vm676_vm0, %v673_v18, 0.0 }
 0x50e   : > { %678 = vadd.xlane.f32.xlu0 %v677_v19 }
 0x510   : > { %v1021_v20 = vpop.eup %1020 }
 0x511   : > { %v763_v21 = vmul.f32 0.6931472, %v1021_v20 }
 0x513   : > { %v764_v22 = vsub.f32 %v755_v6, %v763_v21 }
 0x515   : > { %v765_v23 = vmul.f32 %v764_v22, %v673_v18 }
 0x517   : > { %v766_v24 = vsel %vm676_vm0, %v765_v23, 0.0 }
 0x518   : > { %767 = vadd.xlane.f32.xlu0 %v766_v24 }
 0x59b   : > { %v679_v25 = vpop.xlane.xlu0 %678 }
 0x59c   : > { %v680_v26 = vadd.f32 1.0, %v679_v25 }
 0x59e   : > { %1022 = vrcp.f32 %v680_v26 }
 0x5a5   : > { %v768_v28 = vpop.xlane.xlu0 %767 }
 0x5a8   : > { %v1023_v27 = vpop.eup %1022 }
 0x5a9   : > { %v770_v29 = vmul.f32 %v1023_v27, %v768_v28 }
 0x5ab   : > { %v772_v30 = vsel %vm771_vm4, %v770_v29, 0.0 }
 0x5ac   : > { %773 = vadd.xlane.f32.xlu0 %v772_v30 }
 0x639   : > { %v774_v31 = vpop.xlane.xlu0 %773 }
 0x63a   : > { %v775_v32 = vrot.slane %v774_v31, 4 }
 0x63c   : > { %v776_v33 = vadd.f32 %v775_v32, %v774_v31 }
 0x63e   : > { %v777_v34 = vrot.slane %v776_v33, 2 }
 0x640   : > { %v778_v35 = vadd.f32 %v777_v34, %v776_v33 }
 0x642   : > { %v779_v36 = vrot.slane %v778_v35, 1 }
 0x644   : > { %v780_v37 = vadd.f32 %v779_v36, %v778_v35 }
 0x646   : > { %943 = vpush %v780_v37 }
 0x677   : > { %s944_s10 = spop %943 }
 0x678   : > { %s782_s18 = ssub.f32 0.0, %s944_s10 }
 0x67a   : > { %s783_s8 = smul.f32 0.125, %s782_s18 }
 0x67c   : > { %785 = sst [smem:[#allocation9]] %s783_s8 }
 0x67d PF: > { %p971_p10 = scmp.eq.s32.totalorder %s1242_s28, 1  ;;  %s1112_s12 = scalar_lea.hbm %s1518_s7, 16 }
 0x67e   : > { %p1113_p12 = scmp.ne.s32.totalorder %s1518_s7, %s1112_s12  ;;  %p1118_p13 = scmp.lt.u32.totalorder %s1112_s12, %s1518_s7 }
 0x680   : > { %p1114_p0 = pnand %p1113_p12, %p971_p10 }
 0x682   : > { %p1115_p2 = pneg %p1114_p0 }
 0x684   : > { %p1120_p3 = pnand %p1118_p13, %p1115_p2 }
 0x686   : > { %1123 = shalt.err (!%p1120_p3)
}
 0x687   : > { %s1182_s29 = smov [#allocation9]  }
 0x688   : > { %954 = dma.smem_to_hbm (%p971_p10), %s1182_s29, 16, %s1518_s7, [#allocation5]  }
 0x689   : > { %1153 = dma.done.wait (%p971_p10), [#allocation5], 16  }
 0x68a   : > { %1155 = vsyncadd (%p971_p10), [#allocation5], 4294967280 }
 0x68b   : > { %799 = sfence }
 0x68c PF: > { %p21_p9 = scmp.ge.s32.totalorder %s1268_s11, 4   ;;  %s1531_s24 = smov %s1162_s25 }
 0x68d   : > { %s1532_s25 = smov %s1166_s26  ;;  %s1533_s26 = smov %s1294_s14 }
 0x68e   : > { %s1534_s27 = smov %s1268_s11  ;;  %23 = sbr.rel (!%p21_p9) target bundleno = 6 (0x6), region = 111 }
 0x695   :  { %805 = vsyncpa [#allocation4], 1 }
 0x696   :  { %807 = vsyncpa [#allocation4 + $0x1], 1 }
 0x697   :  { %808 = vsyncpa [#allocation7], 1 }
 0x698   :  { %810 = vsyncpa [#allocation7 + $0x1], 1 }
 0x699   :  { %811 = vsyncpa [#allocation5], 1 }
 0x69a   :  { %813 = vsyncpa [#allocation5 + $0x1], 1 }

</bundles_post_ra>
